<compile_context>
chip_gen: v5e
topology: v5e:2x2
jax: 0.10.0
libtpu: 0.0.40
codegen_flags: <defaults>
</compile_context>

<pallas_src>
import jax
import jax.numpy as jnp
from jax import lax
from jax.experimental import pallas as pl
from jax.experimental.pallas import tpu as pltpu


def _round_up(x, m):
    return ((x + m - 1) // m) * m


def _pick_tile(dim, max_tile, align, slack=1.25):
    """Largest align*2^n tile (<= max_tile) whose padding of `dim` stays within
    `slack`x of the minimum achievable padding (adaptive tile ladder)."""
    cands = []
    t = align
    while t <= max(max_tile, align):
        cands.append(t)
        t *= 2
    padded = {t: _round_up(dim, t) for t in cands}
    best = min(padded.values())
    for t in sorted(cands, reverse=True):
        if padded[t] <= best * slack:
            return t
    return cands[0]


def _gainmod_kernel_acc(x_ref, w_ref, g_ref, b_ref, o_ref, acc_ref):
    """Low-precision output path: f32 scratch accumulator, single final cast."""
    k = pl.program_id(2)

    @pl.when(k == 0)
    def _():
        acc_ref[...] = jnp.zeros_like(acc_ref)

    # x: (tm, tk), w: (tn, tk); contract both on their last (K) axis -> (tm, tn).
    acc_ref[...] += lax.dot_general(
        x_ref[...],
        w_ref[...],
        dimension_numbers=(((1,), (1,)), ((), ())),
        preferred_element_type=jnp.float32,
    )

    @pl.when(k == pl.num_programs(2) - 1)
    def _():
        o_ref[...] = (acc_ref[...] * g_ref[...] + b_ref[...]).astype(o_ref.dtype)


def _gainmod_kernel_f32out(x_ref, w_ref, g_ref, b_ref, o_ref):
    """float32 output path: accumulate straight into the (revisited) output
    block — no scratch, no extra full-tile copy per (i, j)."""
    k = pl.program_id(2)

    partial = lax.dot_general(
        x_ref[...],
        w_ref[...],
        dimension_numbers=(((1,), (1,)), ((), ())),
        preferred_element_type=jnp.float32,
    )

    @pl.when(k == 0)
    def _():
        o_ref[...] = partial

    @pl.when(k > 0)
    def _():
        o_ref[...] += partial

    @pl.when(k == pl.num_programs(2) - 1)
    def _():
        o_ref[...] = o_ref[...] * g_ref[...] + b_ref[...]


class GainModOutPallas:
    """z = x @ weight.T * gains + bias, with params padded once at init."""

    def __init__(self, weight, gains, bias, *, max_tn=512, max_tk=1024):
        Dout, Din = weight.shape
        self.Dout, self.Din = Dout, Din

        # N / K tiles chosen once per layer (lane-aligned to 128).
        self.tn = _pick_tile(Dout, max_tn, 128)
        self.tk = _pick_tile(Din, max_tk, 128)
        self.Doutp = _round_up(Dout, self.tn)
        self.Dinp = _round_up(Din, self.tk)

        # Pad persistent params ONCE (out of the per-call path). Weight stays
        # in its native [Dout, Din] layout; the in-kernel dot_general contracts
        # on its last dim, so no HBM transpose is ever needed.
        if (self.Doutp, self.Dinp) != (Dout, Din):
            weight = jnp.pad(weight, ((0, self.Doutp - Dout), (0, self.Dinp - Din)))
        self.weight = weight
        self.gains = jnp.pad(gains.reshape(1, -1), ((0, 0), (0, self.Doutp - Dout)))
        self.bias = jnp.pad(bias.reshape(1, -1), ((0, 0), (0, self.Doutp - Dout)))

    def __call__(self, x, *, max_tm=512):
        B, Din = x.shape
        assert Din == self.Din, (Din, self.Din)
        out_dtype = x.dtype

        # Sublane multiple depends on packing: 8 (4-byte), 16 (2-byte), 32 (1-byte).
        itemsize = jnp.dtype(x.dtype).itemsize
        align_m = 8 * max(1, 4 // itemsize)
        tm = _pick_tile(B, max_tm, align_m)
        Bp = _round_up(B, tm)

        tn, tk = self.tn, self.tk
        Doutp, Dinp = self.Doutp, self.Dinp

        # v7x: 2 TensorCores sharded over "parallel" grid axes. Ensure at least
        # one parallel axis has >= 2 blocks (no-op on v5e/v6e single-TC chips).
        while Bp // tm == 1 and Doutp // tn == 1 and tn >= 256:
            tn //= 2

        use_scratch = out_dtype != jnp.float32
        xb = itemsize
        wb = jnp.dtype(self.weight.dtype).itemsize
        ob = jnp.dtype(out_dtype).itemsize

        def footprint(tm_, tn_, tk_):
            f = 2 * (tm_ * tk_ * xb + tn_ * tk_ * wb + tm_ * tn_ * ob + 2 * tn_ * 4)
            if use_scratch:
                f += tm_ * tn_ * 4  # f32 accumulator (single-buffered scratch)
            return f

        # Budget the double-buffered footprint against ~40 MiB: safe for v7x's
        # 64 MiB physical VMEM, comfortable on v5e/v6e's 128 MiB.
        budget = 40 << 20
        while footprint(tm, tn, tk) > budget:
            if tk > 128:
                tk //= 2
            elif tn > 128:
                tn //= 2
            elif tm > align_m:
                tm //= 2
            else:
                break

        # Explicit scoped-VMEM limit (defaults: 16 MiB v5e / 32 MiB v6e+v7x can
        # be too small for the larger tiles). Cap below v7x's 64 MiB physical.
        vmem_limit = int(min(max(footprint(tm, tn, tk) * 3 // 2 + (4 << 20),
                                 32 << 20), 56 << 20))

        # Per-call padding of x only when actually required (zeros along K are
        # exact; padded M rows are sliced off below).
        if (Bp, Dinp) != (B, Din):
            x = jnp.pad(x, ((0, Bp - B), (0, Dinp - Din)))

        grid = (Bp // tm, Doutp // tn, Dinp // tk)

        if use_scratch:
            kernel = _gainmod_kernel_acc
            scratch_shapes = [pltpu.VMEM((tm, tn), jnp.float32)]
        else:
            kernel = _gainmod_kernel_f32out
            scratch_shapes = []

        # NOTE: if DMA remains exposed at large shapes, sweep
        # pipeline_mode=pl.Buffered(3) on the x / weight BlockSpecs.
        out = pl.pallas_call(
            kernel,
            out_shape=jax.ShapeDtypeStruct((Bp, Doutp), out_dtype),
            grid_spec=pltpu.PrefetchScalarGridSpec(
                num_scalar_prefetch=0,
                grid=grid,
                in_specs=[
                    pl.BlockSpec((tm, tk), lambda i, j, k: (i, k)),   # x tile
                    pl.BlockSpec((tn, tk), lambda i, j, k: (j, k)),   # weight tile (native layout)
                    pl.BlockSpec((1, tn), lambda i, j, k: (0, j)),    # gains slice
                    pl.BlockSpec((1, tn), lambda i, j, k: (0, j)),    # bias slice
                ],
                out_specs=pl.BlockSpec((tm, tn), lambda i, j, k: (i, j)),
                scratch_shapes=scratch_shapes,
            ),
            compiler_params=pltpu.CompilerParams(
                dimension_semantics=("parallel", "parallel", "arbitrary"),
                vmem_limit_bytes=vmem_limit,
            ),
        )(x, self.weight, self.gains, self.bias)

        return out[:B, : self.Dout]


def gainmod_forward(x, weight, gains, bias):
    """Convenience one-shot wrapper (pads params on every call; prefer
    constructing GainModOutPallas once for repeated use)."""
    return GainModOutPallas(weight, gains, bias)(x)


if __name__ == "__main__":
    # Small shapes consistent with the module (a Linear-like layer).
    B, INPUT_DIM, OUTPUT_DIM = 8, 32, 16
    key = jax.random.PRNGKey(0)
    kx, kw = jax.random.split(key)

    # Deterministic parameter init mirroring __init__:
    #   weight = randn(output_dim, input_dim) * 0.05; bias = zeros; gains = ones
    weight = jax.random.normal(kw, (OUTPUT_DIM, INPUT_DIM), jnp.float32) * 0.05
    bias = jnp.zeros((OUTPUT_DIM,), jnp.float32)
    gains = jnp.ones((OUTPUT_DIM,), jnp.float32)

    x = jax.random.normal(kx, (B, INPUT_DIM), jnp.float32)

    layer = GainModOutPallas(weight, gains, bias)   # params padded once here
    out = layer(x)
    out = jax.block_until_ready(out)

    # Sanity check against plain-JAX reference of the PyTorch forward.
    ref = x @ weight.T * gains + bias
    assert out.shape == (B, OUTPUT_DIM)
    assert jnp.allclose(out, ref, atol=1e-5, rtol=1e-5)

    print("KERNEL_OK")
</pallas_src>

<mosaic_0001>
module attributes {stable_mosaic.version = 11 : i64} {
  func.func @_gainmod_kernel_f32out(%arg0: i32, %arg1: i32, %arg2: i32, %arg3: memref<8x128xf32, #tpu.memory_space<vmem>>, %arg4: memref<128x128xf32, #tpu.memory_space<vmem>>, %arg5: memref<1x128xf32, #tpu.memory_space<vmem>>, %arg6: memref<1x128xf32, #tpu.memory_space<vmem>>, %arg7: memref<8x128xf32, #tpu.memory_space<vmem>>) attributes {dimension_semantics = [#tpu.dimension_semantics<parallel>, #tpu.dimension_semantics<parallel>, #tpu.dimension_semantics<arbitrary>], iteration_bounds = array<i64: 1, 1, 1>, scalar_prefetch = 0 : i64, scratch_operands = 0 : i64, tpu.core_type = #tpu.core_type<tc>, window_params = [{transform_indices = @transform_0, window_bounds = array<i64: 8, 128>}, {transform_indices = @transform_1, window_bounds = array<i64: 128, 128>}, {transform_indices = @transform_2, window_bounds = array<i64: 1, 128>}, {transform_indices = @transform_3, window_bounds = array<i64: 1, 128>}, {transform_indices = @transform_4, window_bounds = array<i64: 8, 128>}]} {
    %c0 = arith.constant 0 : index
    %c0_0 = arith.constant 0 : index
    %0 = vector.load %arg3[%c0, %c0_0] : memref<8x128xf32, #tpu.memory_space<vmem>>, vector<8x128xf32>
    %c0_1 = arith.constant 0 : index
    %c0_2 = arith.constant 0 : index
    %1 = vector.load %arg4[%c0_1, %c0_2] : memref<128x128xf32, #tpu.memory_space<vmem>>, vector<128x128xf32>
    %cst = arith.constant dense<0.000000e+00> : vector<8x128xf32>
    %2 = tpu.matmul %0, %1, %cst {dimension_numbers = #tpu.dot_dimension_numbers<[1], [1], [0], [0], [0, 0, 1, 0], [], []>} : vector<8x128xf32>, vector<128x128xf32>, vector<8x128xf32> -> vector<8x128xf32>
    %c0_i32 = arith.constant 0 : i32
    %3 = arith.cmpi eq, %arg2, %c0_i32 : i32
    %4 = arith.extui %3 : i1 to i32
    %c0_i32_3 = arith.constant 0 : i32
    %5 = arith.cmpi ne, %4, %c0_i32_3 : i32
    scf.if %5 {
      %c0_8 = arith.constant 0 : index
      %c0_9 = arith.constant 0 : index
      %12 = vector.load %arg7[%c0_8, %c0_9] : memref<8x128xf32, #tpu.memory_space<vmem>>, vector<8x128xf32>
      tpu.vector_store %arg7[%c0_8, %c0_9], %2 {strides = array<i32>} : memref<8x128xf32, #tpu.memory_space<vmem>>, vector<8x128xf32>,
    } else {
    }
    %c0_i32_4 = arith.constant 0 : i32
    %6 = arith.cmpi sgt, %arg2, %c0_i32_4 : i32
    %7 = arith.extui %6 : i1 to i32
    %c0_i32_5 = arith.constant 0 : i32
    %8 = arith.cmpi ne, %7, %c0_i32_5 : i32
    scf.if %8 {
      %c0_8 = arith.constant 0 : index
      %c0_9 = arith.constant 0 : index
      %12 = vector.load %arg7[%c0_8, %c0_9] : memref<8x128xf32, #tpu.memory_space<vmem>>, vector<8x128xf32>
      %13 = arith.addf %12, %2 : vector<8x128xf32>
      %c0_10 = arith.constant 0 : index
      %c0_11 = arith.constant 0 : index
      %14 = vector.load %arg7[%c0_10, %c0_11] : memref<8x128xf32, #tpu.memory_space<vmem>>, vector<8x128xf32>
      tpu.vector_store %arg7[%c0_10, %c0_11], %13 {strides = array<i32>} : memref<8x128xf32, #tpu.memory_space<vmem>>, vector<8x128xf32>,
    } else {
    }
    %c0_i32_6 = arith.constant 0 : i32
    %9 = arith.cmpi eq, %arg2, %c0_i32_6 : i32
    %10 = arith.extui %9 : i1 to i32
    %c0_i32_7 = arith.constant 0 : i32
    %11 = arith.cmpi ne, %10, %c0_i32_7 : i32
    scf.if %11 {
      %c0_8 = arith.constant 0 : index
      %c0_9 = arith.constant 0 : index
      %12 = vector.load %arg7[%c0_8, %c0_9] : memref<8x128xf32, #tpu.memory_space<vmem>>, vector<8x128xf32>
      %c0_10 = arith.constant 0 : index
      %c0_11 = arith.constant 0 : index
      %13 = vector.load %arg5[%c0_10, %c0_11] : memref<1x128xf32, #tpu.memory_space<vmem>>, vector<1x128xf32>
      %14 = vector.broadcast %13 : vector<1x128xf32> to vector<8x128xf32>
      %15 = arith.mulf %12, %14 : vector<8x128xf32>
      %c0_12 = arith.constant 0 : index
      %c0_13 = arith.constant 0 : index
      %16 = vector.load %arg6[%c0_12, %c0_13] : memref<1x128xf32, #tpu.memory_space<vmem>>, vector<1x128xf32>
      %17 = vector.broadcast %16 : vector<1x128xf32> to vector<8x128xf32>
      %18 = arith.addf %15, %17 : vector<8x128xf32>
      %c0_14 = arith.constant 0 : index
      %c0_15 = arith.constant 0 : index
      %19 = vector.load %arg7[%c0_14, %c0_15] : memref<8x128xf32, #tpu.memory_space<vmem>>, vector<8x128xf32>
      tpu.vector_store %arg7[%c0_14, %c0_15], %18 {strides = array<i32>} : memref<8x128xf32, #tpu.memory_space<vmem>>, vector<8x128xf32>,
    } else {
    }
    return
  }
  func.func @transform_0(%arg0: i32, %arg1: i32, %arg2: i32) -> (i32, i32) {
    %c0_i32 = arith.constant 0 : i32
    return %arg0, %arg2 : i32, i32
  }
  func.func @transform_1(%arg0: i32, %arg1: i32, %arg2: i32) -> (i32, i32) {
    %c0_i32 = arith.constant 0 : i32
    return %arg1, %arg2 : i32, i32
  }
  func.func @transform_2(%arg0: i32, %arg1: i32, %arg2: i32) -> (i32, i32) {
    %c0_i32 = arith.constant 0 : i32
    %c0_i32_0 = arith.constant 0 : i32
    return %c0_i32, %arg1 : i32, i32
  }
  func.func @transform_3(%arg0: i32, %arg1: i32, %arg2: i32) -> (i32, i32) {
    %c0_i32 = arith.constant 0 : i32
    %c0_i32_0 = arith.constant 0 : i32
    return %c0_i32, %arg1 : i32, i32
  }
  func.func @transform_4(%arg0: i32, %arg1: i32, %arg2: i32) -> (i32, i32) {
    %c0_i32 = arith.constant 0 : i32
    return %arg0, %arg1 : i32, i32
  }
}

</mosaic_0001>

<bundles_post_ra>
// kernel: tpu_custom_call.1
= control target key start
LH: loop header
LB: loop body
LE: loop exit
PB: predicated region body
PF: predicated region fallthrough
CT: control target
= control target key end

     0   :  { %9 = vsyncpa [#allocation3], 0  ;;  %s260_s0 = inlined_call_operand.hbm [shape: f32[8,128], index: 0, kind: input, shape index: {}]   ;;  %s261_s1 = inlined_call_operand.hbm [shape: f32[128,128], index: 1, kind: input, shape index: {}]   ;;  %s262_s2 = inlined_call_operand.vmem [shape: f32[1,128], index: 2, kind: input, shape index: {}]   ;;  %s263_s3 = inlined_call_operand.vmem [shape: f32[1,128], index: 3, kind: input, shape index: {}]   ;;  %s264_s4 = inlined_call_operand.hbm [shape: f32[8,128], index: 4, kind: output, shape index: {}]  }
   0x1   :  { %10 = vsyncpa [#allocation6], 0 }
   0x2   :  { %11 = vsyncpa [#allocation4], 0  ;;  %s17_s17 = sshll.u32 %s260_s0, 4  ;;  %s215_s18 = smov [#allocation2]   ;;  %s18_s17 = int_to_ptr.hbm [resolvable:$true] %s17_s17 }
   0x3   :  { %s19_s19 = sshll.u32 %s215_s18, 4  ;;  %s27_s22 = sshll.u32 %s261_s1, 4  ;;  %s20_s19 = int_to_ptr.vmem [resolvable:$true] %s19_s19  ;;  %s28_s22 = int_to_ptr.hbm [resolvable:$true] %s27_s22 }
   0x4   :  { %22 = dma.hbm_to_vmem [thread:$0]  %s18_s17, 128, %s20_s19, [#allocation3]  }
   0x5   :  { %s216_s23 = smov [#allocation5]   ;;  %s217_s25 = smov 128  }
   0x6   :  { %s29_s24 = sshll.u32 %s216_s23, 4  ;;  %s218_s26 = smov 8   ;;  %s30_s24 = int_to_ptr.vmem [resolvable:$true] %s29_s24 }
   0x7   :  { %35 = dma.hbm_to_vmem [thread:$0]  %s28_s22, 2048, %s30_s24, [#allocation6], %s217_s25, %s217_s25, %s218_s26  }
   0x8   :  { %209 = dma.done.wait [#allocation3], 128  }
   0x9   :  { %210 = vsyncadd [#allocation3], 4294967168 }
   0xa   :  { %211 = dma.done.wait [#allocation6], 2048  }
   0xb   :  { %212 = vsyncadd [#allocation6], 4294965248  ;;  %v64_v0 = vld [vmem:[#allocation5 + $0x78] sm:$0xff]  ;;  %v63_v1 = vld [vmem:[#allocation5 + $0x70] sm:$0xff]  ;;  %s219_s29 = smov [#allocation7]   ;;  %s119_s7 = sshll.u32 %s264_s4, 4  ;;  %s120_s7 = int_to_ptr.hbm [resolvable:$true] %s119_s7 }
   0xc   :  { %65 = vmatpush.xpose.msra.mxu0 %v64_v0  ;;  %v62_v2 = vld [vmem:[#allocation5 + $0x68] sm:$0xff]  ;;  %v61_v3 = vld [vmem:[#allocation5 + $0x60] sm:$0xff]  ;;  %v60_v4 = vld [vmem:[#allocation5 + $0x58] sm:$0xff]  ;;  %s117_s30 = sshll.u32 %s219_s29, 4  ;;  %s118_s30 = int_to_ptr.vmem [resolvable:$true] %s117_s30 }
   0xd   :  { %v59_v5 = vld [vmem:[#allocation5 + $0x50] sm:$0xff]  ;;  %v58_v6 = vld [vmem:[#allocation5 + $0x48] sm:$0xff]  ;;  %v57_v7 = vld [vmem:[#allocation5 + $0x40] sm:$0xff] }
   0xe   :  { %v56_v8 = vld [vmem:[#allocation5 + $0x38] sm:$0xff]  ;;  %v55_v9 = vld [vmem:[#allocation5 + $0x30] sm:$0xff]  ;;  %v54_v10 = vld [vmem:[#allocation5 + $0x28] sm:$0xff] }
   0xf   :  { %v53_v11 = vld [vmem:[#allocation5 + $0x20] sm:$0xff]  ;;  %v52_v12 = vld [vmem:[#allocation5 + $0x18] sm:$0xff]  ;;  %v51_v13 = vld [vmem:[#allocation5 + $0x10] sm:$0xff] }
  0x10   :  { %66 = vmatpush.xpose.msra.mxu0 %v63_v1  ;;  %v50_v14 = vld [vmem:[#allocation5 + $0x8] sm:$0xff]  ;;  %v49_v15 = vld [vmem:[#allocation5] sm:$0xff]  ;;  %v48_v16 = vld [vmem:[#allocation2] sm:$0xff] }
  0x11   :  { %v135_v17 = vld [vmem:[%s262_s2] ss:$0 sm:$0xff] }
  0x12   :  { %v136_v18 = vld [vmem:[%s263_s3] ss:$0 sm:$0xff] }
  0x14   :  { %67 = vmatpush.xpose.msra.mxu0 %v62_v2 }
  0x18   :  { %68 = vmatpush.xpose.msra.mxu0 %v61_v3 }
  0x1c   :  { %69 = vmatpush.xpose.msra.mxu0 %v60_v4 }
  0x20   :  { %70 = vmatpush.xpose.msra.mxu0 %v59_v5 }
  0x24   :  { %71 = vmatpush.xpose.msra.mxu0 %v58_v6 }
  0x28   :  { %72 = vmatpush.xpose.msra.mxu0 %v57_v7 }
  0x2c   :  { %73 = vmatpush.xpose.msra.mxu0 %v56_v8 }
  0x30   :  { %74 = vmatpush.xpose.msra.mxu0 %v55_v9 }
  0x34   :  { %75 = vmatpush.xpose.msra.mxu0 %v54_v10 }
  0x38   :  { %76 = vmatpush.xpose.msra.mxu0 %v53_v11 }
  0x3c   :  { %77 = vmatpush.xpose.msra.mxu0 %v52_v12 }
  0x40   :  { %78 = vmatpush.xpose.msra.mxu0 %v51_v13 }
  0x44   :  { %79 = vmatpush.xpose.msra.mxu0 %v50_v14 }
  0x48   :  { %80 = vmatpush.xpose.msra.mxu0 %v49_v15 }
  0x4b   :  { %81 = vmatmul.f32.vlgmr.msra.gmra.mxu0 %v48_v16 }
  0xc8   :  { %v82_v19 = vpop.f32.mrf.mxu0 }
  0xc9   :  { %v105_v20 = vmul.f32 %v135_v17, %v82_v19 }
  0xcb   :  { %v110_v21 = vadd.f32 %v136_v18, %v105_v20 }
  0xcd   :  { %111 = vst [vmem:[#allocation7] sm:$0xff] %v110_v21 }
  0xce   :  { %122 = dma.vmem_to_hbm [thread:$0]  %s118_s30, 128, %s120_s7, [#allocation4]  }
  0xcf   :  { %213 = dma.done.wait [#allocation4], 128  }
  0xd0   :  { %214 = vsyncadd [#allocation4], 4294967168 }
  0xd1   :  { %127 = vsyncpa [#allocation3], 1 }
  0xd2   :  { %128 = vsyncpa [#allocation6], 1 }
  0xd3   :  { %129 = vsyncpa [#allocation4], 1 }

</bundles_post_ra>
